<compile_context>
chip_gen: v5e
topology: v5e:2x2
jax: 0.10.0
libtpu: 0.0.40
codegen_flags: <defaults>
</compile_context>

<pallas_src>
import math

import jax
import jax.numpy as jnp
from jax.experimental import pallas as pl
from jax.experimental.pallas import tpu as pltpu

LEAKY_SLOPE = 0.01   # torch.nn.functional.leaky_relu default negative_slope
LANE = 128           # TPU vreg lane width
SUBLANE = 16         # bf16 sublane packing (also satisfies the f32 8-row rule)


def _round_up(x, m):
    return (x + m - 1) // m * m


def _leaky_relu(x):
    # mul + max (2 VPU ops) instead of cmp + select; identical for slope in (0, 1).
    return jnp.maximum(x, LEAKY_SLOPE * x)


def dqn_kernel(x_ref, w1_ref, b1_ref, w2_ref, b2_ref, w3_ref, b3_ref, out_ref):
    # x_ref:  (tile_b, n_state)      bf16 activation tile (streamed per grid step)
    # w*_ref: bf16 weights, resident in VMEM for the whole grid
    # b*_ref: (1, dim) f32 biases -> single implicit broadcast per add
    h1 = jnp.dot(x_ref[...], w1_ref[...], preferred_element_type=jnp.float32)
    h1 = _leaky_relu(h1 + b1_ref[...])

    h2 = jnp.dot(h1.astype(jnp.bfloat16), w2_ref[...],
                 preferred_element_type=jnp.float32)
    h2 = _leaky_relu(h2 + b2_ref[...])

    out = jnp.dot(h2.astype(jnp.bfloat16), w3_ref[...],
                  preferred_element_type=jnp.float32)
    out_ref[...] = (out + b3_ref[...]).astype(out_ref.dtype)


def _choose_tile_b(B, tile_b_max):
    """Balanced batch tiles, >=2 whenever B is large enough (v7x megacore)."""
    if B <= SUBLANE:
        return SUBLANE
    n_tiles = max(2, math.ceil(B / tile_b_max))
    tile_b = _round_up(math.ceil(B / n_tiles), SUBLANE)
    return min(tile_b, tile_b_max)


def dqn_forward(state, params, *, tile_b_max=2048):
    """state: [B, n_state]; params from init_dqn_params. Returns [B, n_actions] f32."""
    n_state, _, _, n_actions = params["dims"]
    w1t, b1 = params["w1t"], params["b1"]
    w2t, b2 = params["w2t"], params["b2"]
    w3t, b3 = params["w3t"], params["b3"]

    assert state.ndim == 2 and state.shape[1] == n_state, (
        f"expected state of shape [B, {n_state}], got {state.shape}")
    B = state.shape[0]
    if B == 0:
        return jnp.zeros((0, n_actions), jnp.float32)

    # matches state.to(torch.float32); the matmul operand is bf16 (MXU), so cast
    # once here and stream half the bytes.  No feature-dim padding in HBM.
    x = state.astype(jnp.float32).astype(jnp.bfloat16)

    tile_b = _choose_tile_b(B, tile_b_max)
    b_pad = _round_up(B, tile_b)
    if b_pad != B:
        x = jnp.pad(x, ((0, b_pad - B), (0, 0)))

    grid = (b_pad // tile_b,)

    def resident(arr):  # full-array block, same block (0, 0) every grid step
        return pl.BlockSpec(arr.shape, lambda i: (0, 0))

    out_padded = pl.pallas_call(
        dqn_kernel,
        out_shape=jax.ShapeDtypeStruct((b_pad, n_actions), jnp.float32),
        grid=grid,
        in_specs=[
            # streamed x: full (narrow) last dim -> one contiguous DMA per tile
            pl.BlockSpec((tile_b, n_state), lambda i: (i, 0)),
            resident(w1t), resident(b1),
            resident(w2t), resident(b2),
            resident(w3t), resident(b3),
        ],
        # narrow, full-extent output: minimal writeback bytes
        out_specs=pl.BlockSpec((tile_b, n_actions), lambda i: (i, 0)),
        compiler_params=pltpu.CompilerParams(
            dimension_semantics=("parallel",),   # shard batch grid across TCs (v7x)
            vmem_limit_bytes=16 * 1024 * 1024,   # working set is a few MiB at tile 2048
        ),
    )(x, w1t, b1, w2t, b2, w3t, b3)

    return out_padded[:B]


def init_dqn_params(key, n_state, fc1_dims, fc2_dims, n_actions):
    """Mirrors nn.Linear default init (uniform +/- 1/sqrt(fan_in)).

    Weights are stored transposed [in, out] and cast to bf16 for the MXU.
    Only the VMEM-resident hidden dims are zero-padded to 128 lanes; the
    streamed dims (layer-1 K = n_state, layer-3 N = n_actions) keep their
    real sizes so HBM traffic stays minimal.  Biases stay f32, shape (1, out).
    """
    def linear(key, fan_in, fan_out, pad_in, pad_out):
        kw, kb = jax.random.split(key)
        bound = 1.0 / math.sqrt(fan_in)
        w_t = jax.random.uniform(kw, (fan_in, fan_out), jnp.float32, -bound, bound)
        b = jax.random.uniform(kb, (1, fan_out), jnp.float32, -bound, bound)
        w_t = jnp.pad(w_t, ((0, pad_in - fan_in), (0, pad_out - fan_out)))
        b = jnp.pad(b, ((0, 0), (0, pad_out - fan_out)))
        return w_t.astype(jnp.bfloat16), b

    fc1_p = _round_up(fc1_dims, LANE)
    fc2_p = _round_up(fc2_dims, LANE)
    k1, k2, k3 = jax.random.split(key, 3)
    w1t, b1 = linear(k1, n_state, fc1_dims, n_state, fc1_p)      # K unpadded
    w2t, b2 = linear(k2, fc1_dims, fc2_dims, fc1_p, fc2_p)       # resident, lane-padded
    w3t, b3 = linear(k3, fc2_dims, n_actions, fc2_p, n_actions)  # N unpadded
    return {"w1t": w1t, "b1": b1, "w2t": w2t, "b2": b2, "w3t": w3t, "b3": b3,
            "dims": (n_state, fc1_dims, fc2_dims, n_actions)}


def dqn_forward_ref(state, params):
    """Pure-JAX reference with identical numerics (bf16 matmul operands, f32 accum).
    Note: bf16 operands deviate from torch's f32 nn.Linear by ~2-3 significant
    digits -- intentional (MXU-friendly), fine for DQN training."""
    x = state.astype(jnp.float32).astype(jnp.bfloat16)
    h1 = _leaky_relu(jnp.dot(x, params["w1t"],
                             preferred_element_type=jnp.float32) + params["b1"])
    h2 = _leaky_relu(jnp.dot(h1.astype(jnp.bfloat16), params["w2t"],
                             preferred_element_type=jnp.float32) + params["b2"])
    out = jnp.dot(h2.astype(jnp.bfloat16), params["w3t"],
                  preferred_element_type=jnp.float32) + params["b3"]
    return out


if __name__ == "__main__":
    # Shapes consistent with DeepQNetwork(lr, n_state=8, fc1_dims=32, fc2_dims=32, n_actions=4)
    batch, n_state, fc1_dims, fc2_dims, n_actions = 4, 8, 32, 32, 4

    key = jax.random.PRNGKey(0)
    k_params, k_state, k_big, k_mid = jax.random.split(key, 4)

    params = init_dqn_params(k_params, n_state, fc1_dims, fc2_dims, n_actions)

    # Small batch (single grid step).
    state = jax.random.normal(k_state, (batch, n_state), jnp.float32)
    actions = dqn_forward(state, params)
    jax.block_until_ready(actions)
    ref = dqn_forward_ref(state, params)
    assert actions.shape == (batch, n_actions)
    assert jnp.allclose(actions, ref, atol=2e-3, rtol=2e-3), \
        float(jnp.max(jnp.abs(actions - ref)))

    # Larger, non-tile-multiple batch: exercises the parallel batch grid (>=2 tiles)
    # and the row-padding path.
    big_state = jax.random.normal(k_big, (1000, n_state), jnp.float32)
    big_actions = dqn_forward(big_state, params)
    jax.block_until_ready(big_actions)
    big_ref = dqn_forward_ref(big_state, params)
    assert big_actions.shape == (1000, n_actions)
    assert jnp.allclose(big_actions, big_ref, atol=2e-3, rtol=2e-3)

    # Awkward batch size: balanced tiles (B=520 -> 2 tiles of 272, not b_pad=1024).
    mid_state = jax.random.normal(k_mid, (520, n_state), jnp.float32)
    mid_actions = dqn_forward(mid_state, params)
    jax.block_until_ready(mid_actions)
    assert mid_actions.shape == (520, n_actions)
    assert jnp.allclose(mid_actions, dqn_forward_ref(mid_state, params),
                        atol=2e-3, rtol=2e-3)

    # B = 0 edge case.
    empty = dqn_forward(jnp.zeros((0, n_state), jnp.float32), params)
    assert empty.shape == (0, n_actions)

    # TODO(synk): optimizer (Adam), MSELoss and .to(device) are training/host plumbing,
    # not part of the forward pass, so they are intentionally not implemented in Pallas.
    print("KERNEL_OK")
</pallas_src>

<mosaic_0001>
module attributes {stable_mosaic.version = 11 : i64} {
  func.func @dqn_kernel(%arg0: i32, %arg1: memref<16x8xbf16, #tpu.memory_space<vmem>>, %arg2: memref<8x128xbf16, #tpu.memory_space<vmem>>, %arg3: memref<1x128xf32, #tpu.memory_space<vmem>>, %arg4: memref<128x128xbf16, #tpu.memory_space<vmem>>, %arg5: memref<1x128xf32, #tpu.memory_space<vmem>>, %arg6: memref<128x4xbf16, #tpu.memory_space<vmem>>, %arg7: memref<1x4xf32, #tpu.memory_space<vmem>>, %arg8: memref<16x4xf32, #tpu.memory_space<vmem>>) attributes {dimension_semantics = [#tpu.dimension_semantics<parallel>], iteration_bounds = array<i64: 1>, scalar_prefetch = 0 : i64, scratch_operands = 0 : i64, tpu.core_type = #tpu.core_type<tc>, window_params = [{transform_indices = @transform_0, window_bounds = array<i64: 16, 8>}, {pipeline_mode = #tpu.pipeline_mode<synchronous>, transform_indices = @transform_1, window_bounds = array<i64: 8, 128>}, {pipeline_mode = #tpu.pipeline_mode<synchronous>, transform_indices = @transform_2, window_bounds = array<i64: 1, 128>}, {pipeline_mode = #tpu.pipeline_mode<synchronous>, transform_indices = @transform_3, window_bounds = array<i64: 128, 128>}, {pipeline_mode = #tpu.pipeline_mode<synchronous>, transform_indices = @transform_4, window_bounds = array<i64: 1, 128>}, {pipeline_mode = #tpu.pipeline_mode<synchronous>, transform_indices = @transform_5, window_bounds = array<i64: 128, 4>}, {pipeline_mode = #tpu.pipeline_mode<synchronous>, transform_indices = @transform_6, window_bounds = array<i64: 1, 4>}, {transform_indices = @transform_7, window_bounds = array<i64: 16, 4>}]} {
    %c0 = arith.constant 0 : index
    %c0_0 = arith.constant 0 : index
    %0 = vector.load %arg1[%c0, %c0_0] : memref<16x8xbf16, #tpu.memory_space<vmem>>, vector<16x8xbf16>
    %c0_1 = arith.constant 0 : index
    %c0_2 = arith.constant 0 : index
    %1 = vector.load %arg2[%c0_1, %c0_2] : memref<8x128xbf16, #tpu.memory_space<vmem>>, vector<8x128xbf16>
    %cst = arith.constant dense<0.000000e+00> : vector<16x128xf32>
    %2 = tpu.matmul %0, %1, %cst {dimension_numbers = #tpu.dot_dimension_numbers<[1], [0], [0], [1], [0, 0, 1, 1], [], []>} : vector<16x8xbf16>, vector<8x128xbf16>, vector<16x128xf32> -> vector<16x128xf32>
    %c0_3 = arith.constant 0 : index
    %c0_4 = arith.constant 0 : index
    %3 = vector.load %arg3[%c0_3, %c0_4] : memref<1x128xf32, #tpu.memory_space<vmem>>, vector<1x128xf32>
    %4 = vector.broadcast %3 : vector<1x128xf32> to vector<16x128xf32>
    %5 = arith.addf %2, %4 : vector<16x128xf32>
    %cst_5 = arith.constant 0.00999999977 : f32
    %6 = vector.broadcast %cst_5 : f32 to vector<16x128xf32>
    %7 = arith.mulf %6, %5 : vector<16x128xf32>
    %8 = arith.maximumf %5, %7 : vector<16x128xf32>
    %9 = arith.truncf %8 : vector<16x128xf32> to vector<16x128xbf16>
    %c0_6 = arith.constant 0 : index
    %c0_7 = arith.constant 0 : index
    %10 = vector.load %arg4[%c0_6, %c0_7] : memref<128x128xbf16, #tpu.memory_space<vmem>>, vector<128x128xbf16>
    %cst_8 = arith.constant dense<0.000000e+00> : vector<16x128xf32>
    %11 = tpu.matmul %9, %10, %cst_8 {dimension_numbers = #tpu.dot_dimension_numbers<[1], [0], [0], [1], [0, 0, 1, 1], [], []>} : vector<16x128xbf16>, vector<128x128xbf16>, vector<16x128xf32> -> vector<16x128xf32>
    %c0_9 = arith.constant 0 : index
    %c0_10 = arith.constant 0 : index
    %12 = vector.load %arg5[%c0_9, %c0_10] : memref<1x128xf32, #tpu.memory_space<vmem>>, vector<1x128xf32>
    %13 = vector.broadcast %12 : vector<1x128xf32> to vector<16x128xf32>
    %14 = arith.addf %11, %13 : vector<16x128xf32>
    %cst_11 = arith.constant 0.00999999977 : f32
    %15 = vector.broadcast %cst_11 : f32 to vector<16x128xf32>
    %16 = arith.mulf %15, %14 : vector<16x128xf32>
    %17 = arith.maximumf %14, %16 : vector<16x128xf32>
    %18 = arith.truncf %17 : vector<16x128xf32> to vector<16x128xbf16>
    %c0_12 = arith.constant 0 : index
    %c0_13 = arith.constant 0 : index
    %19 = vector.load %arg6[%c0_12, %c0_13] : memref<128x4xbf16, #tpu.memory_space<vmem>>, vector<128x4xbf16>
    %cst_14 = arith.constant dense<0.000000e+00> : vector<16x4xf32>
    %20 = tpu.matmul %18, %19, %cst_14 {dimension_numbers = #tpu.dot_dimension_numbers<[1], [0], [0], [1], [0, 0, 1, 1], [], []>} : vector<16x128xbf16>, vector<128x4xbf16>, vector<16x4xf32> -> vector<16x4xf32>
    %c0_15 = arith.constant 0 : index
    %c0_16 = arith.constant 0 : index
    %21 = vector.load %arg7[%c0_15, %c0_16] : memref<1x4xf32, #tpu.memory_space<vmem>>, vector<1x4xf32>
    %22 = vector.broadcast %21 : vector<1x4xf32> to vector<16x4xf32>
    %23 = arith.addf %20, %22 : vector<16x4xf32>
    %c0_17 = arith.constant 0 : index
    %c0_18 = arith.constant 0 : index
    %24 = vector.load %arg8[%c0_17, %c0_18] : memref<16x4xf32, #tpu.memory_space<vmem>>, vector<16x4xf32>
    tpu.vector_store %arg8[%c0_17, %c0_18], %23 {strides = array<i32>} : memref<16x4xf32, #tpu.memory_space<vmem>>, vector<16x4xf32>,
    return
  }
  func.func @transform_0(%arg0: i32) -> (i32, i32) {
    %c0_i32 = arith.constant 0 : i32
    %c0_i32_0 = arith.constant 0 : i32
    return %arg0, %c0_i32 : i32, i32
  }
  func.func @transform_1(%arg0: i32) -> (i32, i32) {
    %c0_i32 = arith.constant 0 : i32
    %c0_i32_0 = arith.constant 0 : i32
    %c0_i32_1 = arith.constant 0 : i32
    return %c0_i32, %c0_i32_0 : i32, i32
  }
  func.func @transform_2(%arg0: i32) -> (i32, i32) {
    %c0_i32 = arith.constant 0 : i32
    %c0_i32_0 = arith.constant 0 : i32
    %c0_i32_1 = arith.constant 0 : i32
    return %c0_i32, %c0_i32_0 : i32, i32
  }
  func.func @transform_3(%arg0: i32) -> (i32, i32) {
    %c0_i32 = arith.constant 0 : i32
    %c0_i32_0 = arith.constant 0 : i32
    %c0_i32_1 = arith.constant 0 : i32
    return %c0_i32, %c0_i32_0 : i32, i32
  }
  func.func @transform_4(%arg0: i32) -> (i32, i32) {
    %c0_i32 = arith.constant 0 : i32
    %c0_i32_0 = arith.constant 0 : i32
    %c0_i32_1 = arith.constant 0 : i32
    return %c0_i32, %c0_i32_0 : i32, i32
  }
  func.func @transform_5(%arg0: i32) -> (i32, i32) {
    %c0_i32 = arith.constant 0 : i32
    %c0_i32_0 = arith.constant 0 : i32
    %c0_i32_1 = arith.constant 0 : i32
    return %c0_i32, %c0_i32_0 : i32, i32
  }
  func.func @transform_6(%arg0: i32) -> (i32, i32) {
    %c0_i32 = arith.constant 0 : i32
    %c0_i32_0 = arith.constant 0 : i32
    %c0_i32_1 = arith.constant 0 : i32
    return %c0_i32, %c0_i32_0 : i32, i32
  }
  func.func @transform_7(%arg0: i32) -> (i32, i32) {
    %c0_i32 = arith.constant 0 : i32
    %c0_i32_0 = arith.constant 0 : i32
    return %arg0, %c0_i32 : i32, i32
  }
}

</mosaic_0001>

<bundles_post_ra>
// kernel: tpu_custom_call.1
= control target key start
LH: loop header
LB: loop body
LE: loop exit
PB: predicated region body
PF: predicated region fallthrough
CT: control target
= control target key end

     0   :  { %vm43_vm0 = vcmask 1043456   ;;  %vm39_vm1 = vcmask 64512   ;;  %vm235_vm2 = vcmask 31744   ;;  %s440_s1 = inlined_call_operand.vmem [shape: bf16[8,128], index: 1, kind: input, shape index: {}]   ;;  %s441_s0 = inlined_call_operand.vmem [shape: bf16[16,8], index: 0, kind: input, shape index: {}]   ;;  %s442_s3 = inlined_call_operand.vmem [shape: bf16[128,128], index: 3, kind: input, shape index: {}]   ;;  %s443_s2 = inlined_call_operand.vmem [shape: f32[1,128], index: 2, kind: input, shape index: {}]   ;;  %s444_s4 = inlined_call_operand.vmem [shape: f32[1,128], index: 4, kind: input, shape index: {}]   ;;  %s445_s5 = inlined_call_operand.vmem [shape: bf16[128,4], index: 5, kind: input, shape index: {}]   ;;  %s446_s6 = inlined_call_operand.vmem [shape: f32[1,4], index: 6, kind: input, shape index: {}]   ;;  %s447_s7 = inlined_call_operand.vmem [shape: f32[16,4], index: 7, kind: output, shape index: {}]  }
   0x1   :  { %v29_v0 = vld [vmem:[%s440_s1] sm:$0xf]  ;;  %v319_v1 = vld [vmem:[%s442_s3 + $0x38] sm:$0xff]  ;;  %v318_v4 = vld [vmem:[%s442_s3 + $0x30] sm:$0xff] }
   0x2   :  { %v45_v2 = vsel %vm43_vm0, %v29_v0, 0  ;;  %v311_v3 = vld [vmem:[%s441_s0] sm:$0xff]  ;;  %134 = vmatpush.bf16.msra.mxu1 %v319_v1  ;;  %v317_v5 = vld [vmem:[%s442_s3 + $0x28] sm:$0xff]  ;;  %v315_v7 = vld [vmem:[%s442_s3 + $0x18] sm:$0xff] }
   0x3   :  { %54 = vmatpush.bf16.msra.mxu0 %v45_v2  ;;  %v316_v6 = vld [vmem:[%s442_s3 + $0x20] sm:$0xff]  ;;  %v314_v8 = vld [vmem:[%s442_s3 + $0x10] sm:$0xff]  ;;  %v313_v9 = vld [vmem:[%s442_s3 + $0x8] sm:$0xff] }
   0x4   :  { %v312_v10 = vld [vmem:[%s442_s3] sm:$0xff]  ;;  %v327_v11 = vld [vmem:[%s445_s5 + $0x38] sm:$0xff]  ;;  %v326_v12 = vld [vmem:[%s445_s5 + $0x30] sm:$0xff] }
   0x5   :  { %221 = vmatpush.bf16.msra.mxu2 %v327_v11  ;;  %v325_v13 = vld [vmem:[%s445_s5 + $0x28] sm:$0xff]  ;;  %v324_v14 = vld [vmem:[%s445_s5 + $0x20] sm:$0xff]  ;;  %v323_v25 = vld [vmem:[%s445_s5 + $0x18] sm:$0xff] }
   0x6   :  { %246 = vmatmul.msk.bf16.vlgmr.msra.gmra.mxu0 %vm39_vm1, %v311_v3  ;;  %135 = vmatpush.bf16.msra.mxu1 %v318_v4  ;;  %v328_v16 = vld [vmem:[%s443_s2] ss:$0 sm:$0xff]  ;;  %v322_v26 = vld [vmem:[%s445_s5 + $0x10] sm:$0xff]  ;;  %v321_v27 = vld [vmem:[%s445_s5 + $0x8] sm:$0xff] }
   0x7   :  { %v320_v28 = vld [vmem:[%s445_s5] sm:$0xff] }
   0x8   :  { %v329_v30 = vld [vmem:[%s444_s4] ss:$0 sm:$0xff] }
   0x9   :  { %222 = vmatpush.bf16.msra.mxu2 %v326_v12  ;;  %v330_v39 = vld [vmem:[%s446_s6] ss:$0 sm:$0xff] }
   0xa   :  { %136 = vmatpush.bf16.msra.mxu1 %v317_v5 }
   0xd   :  { %223 = vmatpush.bf16.msra.mxu2 %v325_v13 }
   0xe   :  { %137 = vmatpush.bf16.msra.mxu1 %v316_v6 }
  0x11   :  { %224 = vmatpush.bf16.msra.mxu2 %v324_v14 }
  0x12   :  { %138 = vmatpush.bf16.msra.mxu1 %v315_v7 }
  0x15   :  { %225 = vmatpush.bf16.msra.mxu2 %v323_v25 }
  0x16   :  { %139 = vmatpush.bf16.msra.mxu1 %v314_v8 }
  0x19   :  { %226 = vmatpush.bf16.msra.mxu2 %v322_v26 }
  0x1a   :  { %140 = vmatpush.bf16.msra.mxu1 %v313_v9 }
  0x1d   :  { %227 = vmatpush.bf16.msra.mxu2 %v321_v27 }
  0x1e   :  { %141 = vmatpush.bf16.msra.mxu1 %v312_v10 }
  0x21   :  { %228 = vmatpush.bf16.msra.mxu2 %v320_v28 }
  0x83   :  { %v56_v15 = vpop.f32.mrf.mxu0 }
  0x84   :  { %v57_v17 = vadd.f32 %v328_v16, %v56_v15 }
  0x86   :  { %v61_v19 = vmul.f32 0.01, %v57_v17 }
  0x88   :  { %v63_v22 = vmax.f32 %v57_v17, %v61_v19 }
  0x8b   :  { %v58_v18 = vpop.f32.mrf.mxu0 }
  0x8c   :  { %v59_v20 = vadd.f32 %v328_v16, %v58_v18 }
  0x8e   :  { %v62_v21 = vmul.f32 0.01, %v59_v20 }
  0x90   :  { %v64_v23 = vmax.f32 %v59_v20, %v62_v21 }
  0x92   :  { %v65_v24 = vpack.c.bf16 %v64_v23, %v63_v22 }
  0x94   :  { %142 = vmatmul.bf16.vlgmr.msra.gmra.mxu1 %v65_v24 }
 0x111   :  { %v143_v29 = vpop.f32.mrf.mxu1 }
 0x112   :  { %v144_v31 = vadd.f32 %v329_v30, %v143_v29 }
 0x114   :  { %v148_v33 = vmul.f32 0.01, %v144_v31 }
 0x116   :  { %v150_v36 = vmax.f32 %v144_v31, %v148_v33 }
 0x119   :  { %v145_v32 = vpop.f32.mrf.mxu1 }
 0x11a   :  { %v146_v34 = vadd.f32 %v329_v30, %v145_v32 }
 0x11c   :  { %v149_v35 = vmul.f32 0.01, %v146_v34 }
 0x11e   :  { %v151_v37 = vmax.f32 %v146_v34, %v149_v35 }
 0x120   :  { %v152_v38 = vpack.c.bf16 %v151_v37, %v150_v36 }
 0x122   :  { %229 = vmatmul.bf16.vlgmr.msra.gmra.mxu2 %v152_v38 }
 0x1a5   :  { %v230_v40 = vpop.f32.mrf.mxu2 }
 0x1a6   :  { %v231_v41 = vadd.f32 %v330_v39, %v230_v40 }
 0x1a8   :  { %236 = vst.msk [vmem:[%s447_s7] sm:$0xff] %vm235_vm2, %v231_v41 }
 0x1ad   :  { %v232_v42 = vpop.f32.mrf.mxu2 }
 0x1ae   :  { %v233_v43 = vadd.f32 %v330_v39, %v232_v42 }
 0x1b0   :  { %237 = vst.msk [vmem:[%s447_s7 + $0x8] sm:$0xff] %vm235_vm2, %v233_v43 }

</bundles_post_ra>
